<compile_context>
chip_gen: v7x
topology: tpu7x:2x2x1
jax: 0.10.0
libtpu: 0.0.40
codegen_flags: <defaults>
</compile_context>

<pallas_src>
import math

import jax
import jax.numpy as jnp
from jax.experimental import pallas as pl
from jax.experimental.pallas import tpu as pltpu


def make_positional_encoding_table(d_model: int, max_len: int = 5000) -> jnp.ndarray:
    """Build the `pe` buffer exactly like the torch __init__ (reference check only)."""
    position = jnp.arange(max_len, dtype=jnp.float32)[:, None]            # (max_len, 1)
    div_term = jnp.exp(
        jnp.arange(0, d_model, 2, dtype=jnp.float32) * (-math.log(10000.0) / d_model)
    )
    if d_model % 2 != 0:
        div_term_cos = jnp.exp(
            jnp.arange(0, d_model - 1, 2, dtype=jnp.float32)
            * (-math.log(10000.0) / d_model)
        )
    else:
        div_term_cos = div_term

    pe = jnp.zeros((max_len, 1, d_model), dtype=jnp.float32)
    pe = pe.at[:, 0, 0::2].set(jnp.sin(position * div_term))
    pe = pe.at[:, 0, 1::2].set(jnp.cos(position * div_term_cos))
    return pe


def _pe_add_kernel(sin_tab_ref, cos_tab_ref, s0_ref, c0_ref, x_ref, o_ref):
    # sin_tab/cos_tab : (ts, GBD) resident f32 tables,  B[r,j] = (r*g + lane_group_j)*freq_j + phase_j
    # s0/c0           : (1, 1, GBD) per-block rows,     A[j]   = block_row0 * g * freq_j
    # x/o             : (ts, GBD) lane-dense row block of the input / output
    #
    # Angle addition:  pe = sin(A + B) = sin(A)*cos(B) + cos(A)*sin(B)
    # => ~3 VALU ops/elem; no in-kernel transcendental polynomial.
    pe = s0_ref[0] * cos_tab_ref[...] + c0_ref[0] * sin_tab_ref[...]      # (ts, GBD) f32
    o_ref[...] = (x_ref[...].astype(jnp.float32) + pe).astype(o_ref.dtype)


def _choose_block_rows(Sg: int, GBD: int, itemsize: int,
                       vmem_budget_bytes: int = 36 * 1024 * 1024) -> int:
    """Pick the per-step row count from a *total* VMEM budget.

    Accounts for x-in + out (double-buffered, x dtype) plus the two resident
    f32 sin/cos tables (conservatively counted as double-buffered):
    GBD * (4*itemsize + 16) bytes per row.  The resulting x blocks land around
    3-4.5 MiB, and an even block count is preferred so v7x's 2 TCs split evenly.
    """
    sub = max(8, 32 // max(itemsize, 1))       # native sublane packing: 8 f32 / 16 bf16 / 32 int8
    bytes_per_row = GBD * (4 * itemsize + 16)
    ts_budget = max(sub, vmem_budget_bytes // max(bytes_per_row, 1))

    if ts_budget >= Sg:
        if Sg <= 2 * sub:
            return Sg                          # tiny problem: single full block
        nb = 2                                 # still split so both v7x TCs get work
    else:
        nb = -(-Sg // ts_budget)
        nb += nb % 2                           # even block count for the 2-TC split

    ts = -(-Sg // nb)
    ts = -(-ts // sub) * sub                   # sublane/packing aligned interior blocks
    return min(ts, Sg)


def positional_encoding_forward(x: jnp.ndarray, *, max_len: int = 5000,
                                dropout_p: float = 0.0) -> jnp.ndarray:
    """x: [seq_len, batch, d_model] -> x + pe[:seq_len] (dropout p=0.0 is identity)."""
    S, B, D = x.shape
    assert S <= max_len, f"seq_len {S} exceeds max_len {max_len}"
    BD = B * D

    # --- lane folding: make the trailing (lane) dim a multiple of 128 if possible ---
    g = 128 // math.gcd(BD, 128)               # smallest g with (g*BD) % 128 == 0
    if g > 1 and (S % g != 0):
        g = 1                                  # fallback: correct, just lane-masked stores
    Sg = S // g
    GBD = g * BD
    x2 = x.reshape(Sg, GBD)                    # free, contiguous, lane-dense

    ts = _choose_block_rows(Sg, GBD, x.dtype.itemsize)
    nb = -(-Sg // ts)

    # --- per-lane constants of the flattened g*B*D row (lane j -> d = j % D) ---
    #   even d (sin lane): freq = exp(-d       * ln(1e4)/D), phase = 0
    #   odd  d (cos lane): freq = exp(-(d - 1) * ln(1e4)/D), phase = pi/2   (cos z = sin(z + pi/2))
    d_idx = jnp.arange(D, dtype=jnp.int32)
    exponent = (d_idx - (d_idx % 2)).astype(jnp.float32)
    freq_d = jnp.exp(exponent * (-math.log(10000.0) / D))                 # (D,)
    phase_d = jnp.where(d_idx % 2 == 0, 0.0, math.pi / 2.0).astype(jnp.float32)

    freq = jnp.tile(freq_d, (g * B,))[None, :]                            # (1, GBD)
    phase = jnp.tile(phase_d, (g * B,))[None, :]                          # (1, GBD)
    lane_group = (jnp.arange(GBD, dtype=jnp.int32) // BD).astype(jnp.float32)[None, :]

    # Resident tables:  B[r, j] = (r*g + lane_group_j) * freq_j + phase_j
    r = jnp.arange(ts, dtype=jnp.float32)[:, None]                        # (ts, 1)
    base_angle = (r * float(g) + lane_group) * freq + phase               # (ts, GBD)
    sin_tab = jnp.sin(base_angle)
    cos_tab = jnp.cos(base_angle)

    # Per-block rows:  A[i, j] = (i * ts * g) * freq_j
    blk = jnp.arange(nb, dtype=jnp.float32)[:, None]                      # (nb, 1)
    blk_angle = (blk * float(ts * g)) * freq                              # (nb, GBD)
    s0 = jnp.sin(blk_angle).reshape(nb, 1, GBD)
    c0 = jnp.cos(blk_angle).reshape(nb, 1, GBD)

    out2 = pl.pallas_call(
        _pe_add_kernel,
        out_shape=jax.ShapeDtypeStruct((Sg, GBD), x.dtype),
        grid_spec=pltpu.PrefetchScalarGridSpec(
            num_scalar_prefetch=0,
            grid=(nb,),
            in_specs=[
                pl.BlockSpec((ts, GBD), lambda i: (0, 0)),      # sin table (resident)
                pl.BlockSpec((ts, GBD), lambda i: (0, 0)),      # cos table (resident)
                pl.BlockSpec((1, 1, GBD), lambda i: (i, 0, 0)),  # per-block sin(A)
                pl.BlockSpec((1, 1, GBD), lambda i: (i, 0, 0)),  # per-block cos(A)
                pl.BlockSpec((ts, GBD), lambda i: (i, 0)),      # x rows
            ],
            out_specs=pl.BlockSpec((ts, GBD), lambda i: (i, 0)),
        ),
        compiler_params=pltpu.CompilerParams(
            dimension_semantics=("parallel",),
            vmem_limit_bytes=48 * 1024 * 1024,
        ),
    )(sin_tab, cos_tab, s0, c0, x2)

    # TODO(synk): training-mode dropout with p > 0 is not implemented; the module's
    # default p=0.0 makes dropout an identity in both train and eval.
    del dropout_p
    return out2.reshape(S, B, D)


if __name__ == "__main__":
    pe_full = make_positional_encoding_table(32, max_len=5000)

    # Case 1: module-sized input (exercises the lane-fold path: B*D=64 -> 128 lanes).
    seq_len, batch, d_model = 8, 2, 32
    key = jax.random.PRNGKey(0)
    x = jax.random.normal(key, (seq_len, batch, d_model), dtype=jnp.float32)
    out = jax.block_until_ready(positional_encoding_forward(x))
    ref = x + pe_full[:seq_len]
    assert out.shape == (seq_len, batch, d_model)
    err1 = float(jnp.max(jnp.abs(out - ref)))
    assert jnp.allclose(out, ref, atol=1e-4, rtol=1e-4), f"mismatch (case 1), max abs err {err1}"

    # Case 2: multi-block grid with a partial edge block (S=40 -> folded 20 rows, ts=16).
    seq_len2 = 40
    x2 = jax.random.normal(jax.random.PRNGKey(1), (seq_len2, batch, d_model), dtype=jnp.float32)
    out2 = jax.block_until_ready(positional_encoding_forward(x2))
    ref2 = x2 + pe_full[:seq_len2]
    err2 = float(jnp.max(jnp.abs(out2 - ref2)))
    assert jnp.allclose(out2, ref2, atol=1e-4, rtol=1e-4), f"mismatch (case 2), max abs err {err2}"

    print("KERNEL_OK")
</pallas_src>

<mosaic_0001>
module attributes {stable_mosaic.version = 11 : i64} {
  func.func @_pe_add_kernel(%arg0: i32, %arg1: memref<4x128xf32, #tpu.memory_space<vmem>>, %arg2: memref<4x128xf32, #tpu.memory_space<vmem>>, %arg3: memref<1x1x128xf32, #tpu.memory_space<vmem>>, %arg4: memref<1x1x128xf32, #tpu.memory_space<vmem>>, %arg5: memref<4x128xf32, #tpu.memory_space<vmem>>, %arg6: memref<4x128xf32, #tpu.memory_space<vmem>>) attributes {dimension_semantics = [#tpu.dimension_semantics<parallel>], iteration_bounds = array<i64: 1>, scalar_prefetch = 0 : i64, scratch_operands = 0 : i64, tpu.core_type = #tpu.core_type<tc>, window_params = [{pipeline_mode = #tpu.pipeline_mode<synchronous>, transform_indices = @transform_0, window_bounds = array<i64: 4, 128>}, {pipeline_mode = #tpu.pipeline_mode<synchronous>, transform_indices = @transform_1, window_bounds = array<i64: 4, 128>}, {transform_indices = @transform_2, window_bounds = array<i64: 1, 1, 128>}, {transform_indices = @transform_3, window_bounds = array<i64: 1, 1, 128>}, {transform_indices = @transform_4, window_bounds = array<i64: 4, 128>}, {transform_indices = @transform_5, window_bounds = array<i64: 4, 128>}]} {
    %c0 = arith.constant 0 : index
    %c0_0 = arith.constant 0 : index
    %c0_1 = arith.constant 0 : index
    %0 = vector.load %arg3[%c0, %c0_0, %c0_1] : memref<1x1x128xf32, #tpu.memory_space<vmem>>, vector<1x1x128xf32>
    %1 = vector.shape_cast %0 : vector<1x1x128xf32> to vector<1x128xf32>
    %c0_2 = arith.constant 0 : index
    %c0_3 = arith.constant 0 : index
    %2 = vector.load %arg2[%c0_2, %c0_3] : memref<4x128xf32, #tpu.memory_space<vmem>>, vector<4x128xf32>
    %3 = vector.broadcast %1 : vector<1x128xf32> to vector<4x128xf32>
    %4 = arith.mulf %3, %2 : vector<4x128xf32>
    %c0_4 = arith.constant 0 : index
    %c0_5 = arith.constant 0 : index
    %c0_6 = arith.constant 0 : index
    %5 = vector.load %arg4[%c0_4, %c0_5, %c0_6] : memref<1x1x128xf32, #tpu.memory_space<vmem>>, vector<1x1x128xf32>
    %6 = vector.shape_cast %5 : vector<1x1x128xf32> to vector<1x128xf32>
    %c0_7 = arith.constant 0 : index
    %c0_8 = arith.constant 0 : index
    %7 = vector.load %arg1[%c0_7, %c0_8] : memref<4x128xf32, #tpu.memory_space<vmem>>, vector<4x128xf32>
    %8 = vector.broadcast %6 : vector<1x128xf32> to vector<4x128xf32>
    %9 = arith.mulf %8, %7 : vector<4x128xf32>
    %10 = arith.addf %4, %9 : vector<4x128xf32>
    %c0_9 = arith.constant 0 : index
    %c0_10 = arith.constant 0 : index
    %11 = vector.load %arg5[%c0_9, %c0_10] : memref<4x128xf32, #tpu.memory_space<vmem>>, vector<4x128xf32>
    %12 = arith.addf %11, %10 : vector<4x128xf32>
    %c0_11 = arith.constant 0 : index
    %c0_12 = arith.constant 0 : index
    %13 = vector.load %arg6[%c0_11, %c0_12] : memref<4x128xf32, #tpu.memory_space<vmem>>, vector<4x128xf32>
    tpu.vector_store %arg6[%c0_11, %c0_12], %12 {strides = array<i32>} : memref<4x128xf32, #tpu.memory_space<vmem>>, vector<4x128xf32>,
    return
  }
  func.func @transform_0(%arg0: i32) -> (i32, i32) {
    %c0_i32 = arith.constant 0 : i32
    %c0_i32_0 = arith.constant 0 : i32
    %c0_i32_1 = arith.constant 0 : i32
    return %c0_i32, %c0_i32_0 : i32, i32
  }
  func.func @transform_1(%arg0: i32) -> (i32, i32) {
    %c0_i32 = arith.constant 0 : i32
    %c0_i32_0 = arith.constant 0 : i32
    %c0_i32_1 = arith.constant 0 : i32
    return %c0_i32, %c0_i32_0 : i32, i32
  }
  func.func @transform_2(%arg0: i32) -> (i32, i32, i32) {
    %c0_i32 = arith.constant 0 : i32
    %c0_i32_0 = arith.constant 0 : i32
    %c0_i32_1 = arith.constant 0 : i32
    return %arg0, %c0_i32, %c0_i32_0 : i32, i32, i32
  }
  func.func @transform_3(%arg0: i32) -> (i32, i32, i32) {
    %c0_i32 = arith.constant 0 : i32
    %c0_i32_0 = arith.constant 0 : i32
    %c0_i32_1 = arith.constant 0 : i32
    return %arg0, %c0_i32, %c0_i32_0 : i32, i32, i32
  }
  func.func @transform_4(%arg0: i32) -> (i32, i32) {
    %c0_i32 = arith.constant 0 : i32
    %c0_i32_0 = arith.constant 0 : i32
    return %arg0, %c0_i32 : i32, i32
  }
  func.func @transform_5(%arg0: i32) -> (i32, i32) {
    %c0_i32 = arith.constant 0 : i32
    %c0_i32_0 = arith.constant 0 : i32
    return %arg0, %c0_i32 : i32, i32
  }
}

</mosaic_0001>

<bundles_post_ra>
// kernel: tpu_custom_call.1
= control target key start
LH: loop header
LB: loop body
LE: loop exit
PB: predicated region body
PF: predicated region fallthrough
CT: control target
= control target key end

     0   :  { %10 = vsyncpa [#allocation3], 0  ;;  %s238_s0 = inlined_call_operand.hbm [shape: f32[4,128], index: 0, kind: input, shape index: {}]   ;;  %s239_s1 = inlined_call_operand.hbm [shape: f32[4,128], index: 1, kind: input, shape index: {}]   ;;  %s240_s2 = inlined_call_operand.vmem [shape: f32[1,1,128], index: 2, kind: input, shape index: {}]   ;;  %s241_s3 = inlined_call_operand.vmem [shape: f32[1,1,128], index: 3, kind: input, shape index: {}]   ;;  %s242_s4 = inlined_call_operand.vmem [shape: f32[4,128], index: 4, kind: input, shape index: {}]   ;;  %s243_s5 = inlined_call_operand.hbm [shape: f32[4,128], index: 5, kind: output, shape index: {}]  }
   0x1   :  { %11 = vsyncpa [#allocation6], 0 }
   0x2   :  { %12 = vsyncpa [#allocation4], 0  ;;  %s160_s18 = smov [#allocation2]   ;;  %s161_s20 = smov [#allocation5]  }
   0x3   :  { %s19_s19 = sshll.u32 %s160_s18, 4  ;;  %s29_s21 = sshll.u32 %s161_s20, 4  ;;  %s20_s19 = int_to_ptr.vmem [resolvable:$true] %s19_s19  ;;  %s30_s21 = int_to_ptr.vmem [resolvable:$true] %s29_s21 }
   0x4   :  { %s88_s24 = scalar_lea.hbm %s238_s0, 64 }
   0x5   :  { %p89_p0 = scmp.ne.s32.totalorder %s238_s0, %s88_s24  ;;  %p92_p1 = scmp.lt.u32.totalorder %s88_s24, %s238_s0 }
   0x7   :  { %p94_p2 = pnand %p92_p1, %p89_p0 }
   0x9   :  { %97 = shalt.err (!%p94_p2)
}
   0xa   :  { %s98_s29 = scalar_lea.vmem %s20_s19, 64  ;;  %p103_p4 = scmp.lt.s32.totalorder %s20_s19, %s20_s19 }
   0xb   :  { %p99_p3 = scmp.ne.s32.totalorder %s20_s19, %s98_s29  ;;  %p104_p5 = scmp.lt.s32.totalorder %s98_s29, %s98_s29 }
   0xd   :  { %p105_p6 = por %p104_p5, %p103_p4 }
   0xf   :  { %p106_p7 = pnand %p105_p6, %p99_p3 }
  0x11   :  { %109 = shalt.err (!%p106_p7)
}
  0x12   :  { %22 = dma.hbm_to_vmem [thread:$0]  %s238_s0, 64, %s20_s19, [#allocation3]  }
  0x13   :  { %s110_s9 = scalar_lea.hbm %s239_s1, 64 }
  0x14   :  { %p111_p8 = scmp.ne.s32.totalorder %s239_s1, %s110_s9  ;;  %p114_p9 = scmp.lt.u32.totalorder %s110_s9, %s239_s1 }
  0x16   :  { %p116_p10 = pnand %p114_p9, %p111_p8 }
  0x18   :  { %119 = shalt.err (!%p116_p10)
}
  0x19   :  { %s120_s14 = scalar_lea.vmem %s30_s21, 64  ;;  %p125_p12 = scmp.lt.s32.totalorder %s30_s21, %s30_s21 }
  0x1a   :  { %p121_p11 = scmp.ne.s32.totalorder %s30_s21, %s120_s14  ;;  %p126_p13 = scmp.lt.s32.totalorder %s120_s14, %s120_s14 }
  0x1c   :  { %p127_p0 = por %p126_p13, %p125_p12 }
  0x1e   :  { %p128_p1 = pnand %p127_p0, %p121_p11 }
  0x20   :  { %131 = shalt.err (!%p128_p1)
}
  0x21   :  { %32 = dma.hbm_to_vmem [thread:$0]  %s239_s1, 64, %s30_s21, [#allocation6]  }
  0x22   :  { %154 = dma.done.wait [#allocation3], 64  }
  0x23   :  { %155 = vsyncadd [#allocation3], 4294967232 }
  0x24   :  { %156 = dma.done.wait [#allocation6], 64  }
  0x25   :  { %157 = vsyncadd [#allocation6], 4294967232  ;;  %v83_v0 = vld [vmem:[%s240_s2] ss:$0 sm:$0xff]  ;;  %v46_v1 = vld [vmem:[#allocation5] sm:$0xf] }
  0x26   :  { %v84_v2 = vld [vmem:[%s241_s3] ss:$0 sm:$0xff]  ;;  %v53_v3 = vmul.f32 %v83_v0, %v46_v1  ;;  %s162_s1 = smov [#allocation7]  }
  0x27   :  { %v55_v4 = vld [vmem:[#allocation2] sm:$0xf]  ;;  %s73_s21 = sshll.u32 %s162_s1, 4  ;;  %s74_s21 = int_to_ptr.vmem [resolvable:$true] %s73_s21 }
  0x28   :  { %v62_v5 = vmul.f32 %v84_v2, %v55_v4  ;;  %v64_v6 = vld [vmem:[%s242_s4] sm:$0xf]  ;;  %s132_s23 = scalar_lea.vmem %s74_s21, 64  ;;  %p137_p3 = scmp.lt.s32.totalorder %s74_s21, %s74_s21 }
  0x29   :  { %p133_p2 = scmp.ne.s32.totalorder %s74_s21, %s132_s23  ;;  %p138_p4 = scmp.lt.s32.totalorder %s132_s23, %s132_s23 }
  0x2a   :  { %v63_v7 = vadd.f32 %v62_v5, %v53_v3 }
  0x2b   :  { %p139_p5 = por %p138_p4, %p137_p3 }
  0x2c   :  { %v65_v8 = vadd.f32 %v64_v6, %v63_v7 }
  0x2d   :  { %p140_p6 = pnand %p139_p5, %p133_p2 }
  0x2e   :  { %66 = vst [vmem:[#allocation7] sm:$0xf] %v65_v8 }
  0x2f   :  { %143 = shalt.err (!%p140_p6)
}
  0x30   :  { %s144_s24 = scalar_lea.hbm %s243_s5, 64 }
  0x31   :  { %p145_p7 = scmp.ne.s32.totalorder %s243_s5, %s144_s24  ;;  %p148_p8 = scmp.lt.u32.totalorder %s144_s24, %s243_s5 }
  0x33   :  { %p150_p9 = pnand %p148_p8, %p145_p7 }
  0x35   :  { %153 = shalt.err (!%p150_p9)
}
  0x36   :  { %76 = dma.vmem_to_hbm [thread:$0]  %s74_s21, 64, %s243_s5, [#allocation4]  }
  0x37   :  { %158 = dma.done.wait [#allocation4], 64  }
  0x38   :  { %159 = vsyncadd [#allocation4], 4294967232 }
  0x39   :  { %80 = vsyncpa [#allocation3], 1 }
  0x3a   :  { %81 = vsyncpa [#allocation6], 1 }
  0x3b   :  { %82 = vsyncpa [#allocation4], 1 }

</bundles_post_ra>
